<compile_context>
chip_gen: v7x
topology: tpu7x:2x2x1
jax: 0.10.0
libtpu: 0.0.40
codegen_flags: <defaults>
</compile_context>

<pallas_src>
import jax
import jax.numpy as jnp
from jax.experimental import pallas as pl
from jax.experimental.pallas import tpu as pltpu

LOG_EPS = -70.0
MASK_WEIGHT = (1.0, 1.0)                      # self.mask_weight = [1.0, 1.0]
_USE_MASK_WEIGHT = MASK_WEIGHT != (1.0, 1.0)  # trace-time constant


# ---------------------------------------------------------------------------
# Pallas kernel: per-batch-tile loss terms, native (TB, C, S) blocks,
# class reduction + sequence mean inside the kernel.
# ---------------------------------------------------------------------------
def _make_loss_kernel(d_label, seq_len, use_mask_weight):
    inv_s = 1.0 / float(seq_len)

    def kernel(*refs):
        if use_mask_weight:
            tgt_ref, xt_ref, lr_ref, lm_ref, lt_ref, out_ref = refs
        else:
            tgt_ref, lr_ref, lm_ref, lt_ref, out_ref = refs

        # Native-dtype loads (bf16 streams), upcast to f32 for the math.
        tgt = tgt_ref[...]                          # (TB, 1, S) int32
        lr_t = lr_ref[...].astype(jnp.float32)      # (TB, 1, S) log_x0_recon[tgt]
        lm = lm_ref[...].astype(jnp.float32)        # (TB, C, S) log_model_prob
        lt = lt_ref[...].astype(jnp.float32)        # (TB, C, S) log_true_prob
        TB, C, S = lm.shape

        # multinomial_kl(log_true_prob, log_model_prob): reduce over classes.
        kl_pos = jnp.sum(jnp.exp(lt) * (lt - lm), axis=1, keepdims=True)     # (TB,1,S)

        # decoder_nll = -log_model_prob[tgt]  (log_x_start is the exact
        # log-one-hot of tgt; exp(-70) off-target terms of the reference are
        # dropped -- numerically negligible).
        c_iota = jax.lax.broadcasted_iota(jnp.int32, (TB, C, S), 1)
        onehot = c_iota == tgt                                               # (TB,C,S)
        nll_pos = -jnp.sum(jnp.where(onehot, lm, 0.0), axis=1, keepdims=True)

        # kl_aux over classes [0, C-1): = -log_x0_recon[tgt], 0 where tgt=='mask'
        aux_pos = jnp.where(tgt < (d_label - 1), -lr_t, 0.0)                 # (TB,1,S)

        if use_mask_weight:  # folded away at trace time for the default (1, 1)
            mask_region = (xt_ref[...] == (d_label - 1)).astype(jnp.float32)
            mw = (mask_region * MASK_WEIGHT[0]
                  + (1.0 - mask_region) * MASK_WEIGHT[1])
            kl_pos = kl_pos * mw
            aux_pos = aux_pos * mw

        # mean over the sequence (lane) axis -> three scalars per batch row.
        kl_m = jnp.sum(kl_pos, axis=-1, keepdims=True) * inv_s               # (TB,1,1)
        nll_m = jnp.sum(nll_pos, axis=-1, keepdims=True) * inv_s
        aux_m = jnp.sum(aux_pos, axis=-1, keepdims=True) * inv_s

        # Pack (kl, nll, aux) into one (TB, 1, 3) block with a branch-free
        # iota/select -> a single full-block store (no lane concat, no three
        # sliced masked stores).
        j = jax.lax.broadcasted_iota(jnp.int32, (TB, 1, 3), 2)
        out_ref[...] = jnp.where(j == 0, kl_m, jnp.where(j == 1, nll_m, aux_m))

    return kernel


# ---------------------------------------------------------------------------
# Generation-aware tiling helpers
# ---------------------------------------------------------------------------
def _tpu_budgets():
    """VMEM budgets per TPU generation (v5e/v6e: 128 MiB, v7x: 64 MiB/TC)."""
    try:
        cap = int(pltpu.get_tpu_info().vmem_capacity_bytes)
    except Exception:
        cap = 64 * 1024 * 1024            # conservative fallback
    if cap >= 96 * 1024 * 1024:           # v5e / v6e: take big blocks
        return dict(vmem_limit=100 * 1024 * 1024,
                    tile_budget=80 * 1024 * 1024,
                    prefer_multi_step=False)
    # v7x: smaller VMEM, 2 TensorCores -> keep >= 2 "parallel" grid steps.
    return dict(vmem_limit=48 * 1024 * 1024,
                tile_budget=36 * 1024 * 1024,
                prefer_multi_step=True)


def _block_vmem_bytes(tb, C, S, log_itemsize):
    """Double-buffered VMEM footprint of one grid step, incl. (8,128) padding
    and per-stream dtypes."""
    s_pad = -(-S // 128) * 128
    c_pad = -(-C // 8) * 8
    big = 2 * 2 * tb * c_pad * s_pad * log_itemsize           # lm + lt streams
    rows = 2 * tb * 8 * s_pad * (4 + log_itemsize)            # tgt (i32) + lr[tgt]
    if _USE_MASK_WEIGHT:
        rows += 2 * tb * 8 * s_pad * 4                        # x_t (i32)
    out = 2 * tb * 8 * 128 * 4                                # (tb,1,3) f32 output
    return big + rows + out


def _choose_batch_tile(B, C, S, log_itemsize, tile_budget, prefer_multi_step):
    cands = [tb for tb in range(1, B + 1) if B % tb == 0]
    fitting = [tb for tb in cands
               if _block_vmem_bytes(tb, C, S, log_itemsize) <= tile_budget]
    if not fitting:
        # TODO(synk): for production C*S too large for a single block, add a
        # C-tile (reduction) grid axis with VMEM scratch accumulators
        # finalized via pl.when instead of falling back to tb=1.
        fitting = [1]
    if prefer_multi_step and B >= 2:
        multi = [tb for tb in fitting if B // tb >= 2]
        if multi:
            return max(multi)
    return max(fitting)


# ---------------------------------------------------------------------------
# Wrapper: pallas_call + tiny O(B) epilogue
# ---------------------------------------------------------------------------
def forward_loss_pallas(t, pt, tgt, x_t, log_x0_recon_at_tgt, log_model_prob,
                        log_true_prob, *, num_timesteps, aux_weight):
    B, C, S = log_model_prob.shape
    log_itemsize = jnp.dtype(log_model_prob.dtype).itemsize
    budgets = _tpu_budgets()
    TB = _choose_batch_tile(B, C, S, log_itemsize,
                            budgets["tile_budget"],
                            budgets["prefer_multi_step"])
    nb = B // TB

    # Free metadata reshapes only (no transpose / extra HBM pass).
    tgt3 = tgt.reshape(B, 1, S).astype(jnp.int32)
    lr3 = log_x0_recon_at_tgt.reshape(B, 1, S)

    row_spec = pl.BlockSpec((TB, 1, S), lambda i: (i, 0, 0))
    log_spec = pl.BlockSpec((TB, C, S), lambda i: (i, 0, 0))
    out_spec = pl.BlockSpec((TB, 1, 3), lambda i: (i, 0, 0))

    kernel = _make_loss_kernel(C, S, _USE_MASK_WEIGHT)

    operands = [tgt3]
    in_specs = [row_spec]
    if _USE_MASK_WEIGHT:                      # x_t DMA'd only if actually read
        operands.append(x_t.reshape(B, 1, S).astype(jnp.int32))
        in_specs.append(row_spec)
    operands += [lr3, log_model_prob, log_true_prob]
    in_specs += [row_spec, log_spec, log_spec]

    per_batch = pl.pallas_call(
        kernel,
        grid=(nb,),
        in_specs=in_specs,
        out_specs=out_spec,
        out_shape=jax.ShapeDtypeStruct((B, 1, 3), jnp.float32),
        compiler_params=pltpu.CompilerParams(
            dimension_semantics=("parallel",),   # batch tiles are independent
            vmem_limit_bytes=budgets["vmem_limit"]),
    )(*operands)

    kl_mean = per_batch[:, 0, 0]
    nll_mean = per_batch[:, 0, 1]
    aux_mean = per_batch[:, 0, 2]

    # Tiny O(B) epilogue: t==0 gating, importance re-weighting (1/pt) and
    # adaptive auxiliary-loss weighting.
    t_f = t.astype(jnp.float32)
    pt_f = pt.astype(jnp.float32)
    is_t0 = (t == 0).astype(jnp.float32)

    kl_loss = is_t0 * nll_mean + (1.0 - is_t0) * kl_mean
    loss1 = kl_loss / pt_f

    kl_aux_loss = is_t0 * nll_mean + (1.0 - is_t0) * aux_mean
    add_w = 1.0 - t_f / float(num_timesteps) + 1.0
    loss2 = add_w * aux_weight * kl_aux_loss / pt_f
    return kl_loss, loss1, loss2


# ---------------------------------------------------------------------------
# Plain-JAX glue (synthetic stand-ins for the abstract model / q_posterior)
# ---------------------------------------------------------------------------
def index_to_log_onehot(x, num_classes):
    onehot = jax.nn.one_hot(x, num_classes)                 # (B, S, C)
    onehot = jnp.transpose(onehot, (0, 2, 1))               # (B, C, S)
    return jnp.where(onehot > 0.5, 0.0, LOG_EPS).astype(jnp.float32)


def synthetic_core(tgt, key, d_label, num_timesteps):
    # TODO(synk): core()/q_pred()/q_sample() (transition-matrix forward
    # diffusion), q_posterior() and DiscreteDiffusionDecoder are abstract /
    # not provided in the reference; their outputs are synthesized here
    # deterministically, directly in the (B, C, S) bf16 layout the kernel
    # streams so no extra HBM pass precedes the kernel.
    B, S = tgt.shape
    k1, k2, k3, k4, k5 = jax.random.split(key, 5)

    t = jax.random.randint(k1, (B,), 0, num_timesteps)      # 'uniform' fallback
    pt = jnp.ones((B,), jnp.float32) / float(num_timesteps)

    log_x_start = index_to_log_onehot(tgt, d_label)         # reference check only

    mask_flag = jax.random.bernoulli(k2, 0.5, (B, S))       # stand-in q_sample
    x_t = jnp.where(mask_flag, d_label - 1, tgt).astype(jnp.int32)

    # stand-in predict_start(): log_softmax over real classes, -70 on 'mask'
    logits = jax.random.normal(k3, (B, d_label - 1, S), jnp.float32)
    log_pred = jax.nn.log_softmax(logits, axis=1)
    log_x0_recon = jnp.concatenate(
        [log_pred, jnp.full((B, 1, S), LOG_EPS, jnp.float32)], axis=1)
    log_x0_recon = jnp.clip(log_x0_recon, LOG_EPS, 0.0).astype(jnp.bfloat16)

    # stand-ins for p_pred / q_posterior outputs (bf16 HBM streams).
    log_model_prob = jax.nn.log_softmax(
        jax.random.normal(k4, (B, d_label, S), jnp.float32), axis=1).astype(jnp.bfloat16)
    log_true_prob = jax.nn.log_softmax(
        jax.random.normal(k5, (B, d_label, S), jnp.float32), axis=1).astype(jnp.bfloat16)

    return t, pt, log_x_start, log_x0_recon, log_model_prob, log_true_prob, x_t


def forward(tgt, memory, key, *, d_label, num_timesteps, auxiliary_loss_weight):
    # memory is only consumed by the (unavailable) decoder; kept for parity.
    del memory
    (t, pt, log_x_start, log_x0_recon, log_model_prob,
     log_true_prob, x_t) = synthetic_core(tgt, key, d_label, num_timesteps)

    # kl_aux only needs log_x0_recon at the ground-truth token; gather the
    # (B, 1, S) row here (in a real pipeline this fuses into predict_start's
    # log_softmax producer) instead of streaming the full (B, C, S) tensor.
    log_x0_recon_at_tgt = jnp.take_along_axis(
        log_x0_recon, tgt[:, None, :].astype(jnp.int32), axis=1)

    kl_loss, loss1, loss2 = forward_loss_pallas(
        t, pt, tgt, x_t, log_x0_recon_at_tgt, log_model_prob, log_true_prob,
        num_timesteps=num_timesteps, aux_weight=auxiliary_loss_weight)

    # TODO(synk): update_Lt / update_list mutate training buffers & python
    # lists (Lt_history scatter, diffusion_acc_list); side-effect-only, omitted.
    outputs = {"logits": log_model_prob}
    losses = {"kl_loss": loss1.mean()}
    if auxiliary_loss_weight > 0.0:
        losses["aux_loss"] = loss2.mean()
    return outputs, losses, (t, pt, log_x_start, log_x0_recon,
                             log_model_prob, log_true_prob, x_t,
                             kl_loss, loss1, loss2)


def reference_losses(t, pt, log_x_start, log_x0_recon, log_model_prob,
                     log_true_prob, x_t, num_timesteps, aux_weight, d_label):
    lm = log_model_prob.astype(jnp.float32)
    lt = log_true_prob.astype(jnp.float32)
    lr = log_x0_recon.astype(jnp.float32)
    kl = jnp.sum(jnp.exp(lt) * (lt - lm), axis=1)
    mask_region = (x_t == d_label - 1).astype(jnp.float32)
    mask_weight = mask_region * MASK_WEIGHT[0] + (1.0 - mask_region) * MASK_WEIGHT[1]
    kl = jnp.mean(kl * mask_weight, axis=1)
    decoder_nll = jnp.mean(-jnp.sum(jnp.exp(log_x_start) * lm, axis=1), axis=1)
    mask = (t == 0).astype(jnp.float32)
    kl_loss = mask * decoder_nll + (1.0 - mask) * kl
    loss1 = kl_loss / pt
    kl_aux = jnp.sum(jnp.exp(log_x_start[:, :-1]) *
                     (log_x_start[:, :-1] - lr[:, :-1]), axis=1)
    kl_aux = jnp.mean(kl_aux * mask_weight, axis=1)
    kl_aux_loss = mask * decoder_nll + (1.0 - mask) * kl_aux
    add_w = 1.0 - t / num_timesteps + 1.0
    loss2 = add_w * aux_weight * kl_aux_loss / pt
    return kl_loss, loss1, loss2


if __name__ == "__main__":
    B = 2                    # batch
    D_LABEL = 16             # tokenizer.N_total (last id == 'mask')
    MAX_TOKEN_LENGTH = 8     # tokenizer.max_token_length
    NUM_TIMESTEPS = 10
    AUX_WEIGHT = 0.1
    D_MODEL = 32

    key = jax.random.PRNGKey(0)
    k_tgt, k_mem, k_core = jax.random.split(key, 3)
    tgt = jax.random.randint(k_tgt, (B, MAX_TOKEN_LENGTH), 0, D_LABEL - 2)
    memory = jax.random.normal(k_mem, (B, MAX_TOKEN_LENGTH, D_MODEL), jnp.float32)

    outputs, losses, dbg = forward(
        tgt, memory, k_core, d_label=D_LABEL, num_timesteps=NUM_TIMESTEPS,
        auxiliary_loss_weight=AUX_WEIGHT)
    jax.block_until_ready(losses["kl_loss"])
    jax.block_until_ready(losses["aux_loss"])
    jax.block_until_ready(outputs["logits"])

    # numerical check against a pure-JAX reference of the forward() loss math
    # (computed from the same bf16 HBM streams, upcast to f32).
    (t, pt, log_x_start, log_x0_recon, log_model_prob, log_true_prob,
     x_t, kl_loss_k, loss1_k, loss2_k) = dbg
    kl_loss_r, loss1_r, loss2_r = reference_losses(
        t, pt, log_x_start, log_x0_recon, log_model_prob, log_true_prob, x_t,
        NUM_TIMESTEPS, AUX_WEIGHT, D_LABEL)
    assert jnp.allclose(kl_loss_k, kl_loss_r, atol=1e-4, rtol=1e-4)
    assert jnp.allclose(loss1_k, loss1_r, atol=1e-3, rtol=1e-4)
    assert jnp.allclose(loss2_k, loss2_r, atol=1e-3, rtol=1e-4)

    print("KERNEL_OK")
</pallas_src>

<mosaic_0001>
module attributes {stable_mosaic.version = 11 : i64} {
  func.func @kernel(%arg0: i32, %arg1: memref<1x1x8xi32, #tpu.memory_space<vmem>>, %arg2: memref<1x1x8xbf16, #tpu.memory_space<vmem>>, %arg3: memref<1x16x8xbf16, #tpu.memory_space<vmem>>, %arg4: memref<1x16x8xbf16, #tpu.memory_space<vmem>>, %arg5: memref<1x1x3xf32, #tpu.memory_space<vmem>>) attributes {dimension_semantics = [#tpu.dimension_semantics<parallel>], iteration_bounds = array<i64: 2>, scalar_prefetch = 0 : i64, scratch_operands = 0 : i64, tpu.core_type = #tpu.core_type<tc>, window_params = [{transform_indices = @transform_0, window_bounds = array<i64: 1, 1, 8>}, {transform_indices = @transform_1, window_bounds = array<i64: 1, 1, 8>}, {transform_indices = @transform_2, window_bounds = array<i64: 1, 16, 8>}, {transform_indices = @transform_3, window_bounds = array<i64: 1, 16, 8>}, {transform_indices = @transform_4, window_bounds = array<i64: 1, 1, 3>}]} {
    %c0 = arith.constant 0 : index
    %c0_0 = arith.constant 0 : index
    %c0_1 = arith.constant 0 : index
    %0 = vector.load %arg1[%c0, %c0_0, %c0_1] : memref<1x1x8xi32, #tpu.memory_space<vmem>>, vector<1x1x8xi32>
    %c0_2 = arith.constant 0 : index
    %c0_3 = arith.constant 0 : index
    %c0_4 = arith.constant 0 : index
    %1 = vector.load %arg2[%c0_2, %c0_3, %c0_4] : memref<1x1x8xbf16, #tpu.memory_space<vmem>>, vector<1x1x8xbf16>
    %2 = arith.extf %1 : vector<1x1x8xbf16> to vector<1x1x8xf32>
    %c0_5 = arith.constant 0 : index
    %c0_6 = arith.constant 0 : index
    %c0_7 = arith.constant 0 : index
    %3 = vector.load %arg3[%c0_5, %c0_6, %c0_7] : memref<1x16x8xbf16, #tpu.memory_space<vmem>>, vector<1x16x8xbf16>
    %4 = arith.extf %3 : vector<1x16x8xbf16> to vector<1x16x8xf32>
    %c0_8 = arith.constant 0 : index
    %c0_9 = arith.constant 0 : index
    %c0_10 = arith.constant 0 : index
    %5 = vector.load %arg4[%c0_8, %c0_9, %c0_10] : memref<1x16x8xbf16, #tpu.memory_space<vmem>>, vector<1x16x8xbf16>
    %6 = arith.extf %5 : vector<1x16x8xbf16> to vector<1x16x8xf32>
    %7 = math.exp %6 : vector<1x16x8xf32>
    %8 = arith.subf %6, %4 : vector<1x16x8xf32>
    %9 = arith.mulf %7, %8 : vector<1x16x8xf32>
    %cst = arith.constant dense<0.000000e+00> : vector<1x8xf32>
    %10 = vector.multi_reduction <add>, %9, %cst [1] : vector<1x16x8xf32> to vector<1x8xf32>
    %11 = vector.shape_cast %10 : vector<1x8xf32> to vector<1x1x8xf32>
    %12 = tpu.iota {dimensions = array<i32: 1>} : vector<1x16x8xi32>
    %13 = vector.broadcast %0 : vector<1x1x8xi32> to vector<1x16x8xi32>
    %14 = arith.cmpi eq, %12, %13 : vector<1x16x8xi32>
    %cst_11 = arith.constant 0.000000e+00 : f32
    %15 = vector.broadcast %cst_11 : f32 to vector<1x16x8xf32>
    %16 = arith.select %14, %4, %15 : vector<1x16x8xi1>, vector<1x16x8xf32>
    %cst_12 = arith.constant dense<0.000000e+00> : vector<1x8xf32>
    %17 = vector.multi_reduction <add>, %16, %cst_12 [1] : vector<1x16x8xf32> to vector<1x8xf32>
    %18 = vector.shape_cast %17 : vector<1x8xf32> to vector<1x1x8xf32>
    %cst_13 = arith.constant 0.000000e+00 : f32
    %19 = vector.broadcast %cst_13 : f32 to vector<1x1x8xf32>
    %20 = arith.subf %19, %18 : vector<1x1x8xf32>
    %c15_i32 = arith.constant 15 : i32
    %21 = vector.broadcast %c15_i32 : i32 to vector<1x1x8xi32>
    %22 = arith.cmpi slt, %0, %21 : vector<1x1x8xi32>
    %cst_14 = arith.constant 0.000000e+00 : f32
    %23 = vector.broadcast %cst_14 : f32 to vector<1x1x8xf32>
    %24 = arith.subf %23, %2 : vector<1x1x8xf32>
    %cst_15 = arith.constant 0.000000e+00 : f32
    %25 = vector.broadcast %cst_15 : f32 to vector<1x1x8xf32>
    %26 = arith.select %22, %24, %25 : vector<1x1x8xi1>, vector<1x1x8xf32>
    %cst_16 = arith.constant dense<0.000000e+00> : vector<1x1xf32>
    %27 = vector.multi_reduction <add>, %11, %cst_16 [2] : vector<1x1x8xf32> to vector<1x1xf32>
    %28 = vector.shape_cast %27 : vector<1x1xf32> to vector<1x1x1xf32>
    %cst_17 = arith.constant 1.250000e-01 : f32
    %29 = vector.broadcast %cst_17 : f32 to vector<1x1x1xf32>
    %30 = arith.mulf %28, %29 : vector<1x1x1xf32>
    %cst_18 = arith.constant dense<0.000000e+00> : vector<1x1xf32>
    %31 = vector.multi_reduction <add>, %20, %cst_18 [2] : vector<1x1x8xf32> to vector<1x1xf32>
    %32 = vector.shape_cast %31 : vector<1x1xf32> to vector<1x1x1xf32>
    %cst_19 = arith.constant 1.250000e-01 : f32
    %33 = vector.broadcast %cst_19 : f32 to vector<1x1x1xf32>
    %34 = arith.mulf %32, %33 : vector<1x1x1xf32>
    %cst_20 = arith.constant dense<0.000000e+00> : vector<1x1xf32>
    %35 = vector.multi_reduction <add>, %26, %cst_20 [2] : vector<1x1x8xf32> to vector<1x1xf32>
    %36 = vector.shape_cast %35 : vector<1x1xf32> to vector<1x1x1xf32>
    %cst_21 = arith.constant 1.250000e-01 : f32
    %37 = vector.broadcast %cst_21 : f32 to vector<1x1x1xf32>
    %38 = arith.mulf %36, %37 : vector<1x1x1xf32>
    %39 = tpu.iota {dimensions = array<i32: 2>} : vector<1x1x3xi32>
    %c0_i32 = arith.constant 0 : i32
    %40 = vector.broadcast %c0_i32 : i32 to vector<1x1x3xi32>
    %41 = arith.cmpi eq, %39, %40 : vector<1x1x3xi32>
    %c1_i32 = arith.constant 1 : i32
    %42 = vector.broadcast %c1_i32 : i32 to vector<1x1x3xi32>
    %43 = arith.cmpi eq, %39, %42 : vector<1x1x3xi32>
    %44 = vector.shape_cast %34 : vector<1x1x1xf32> to vector<1x1x1xf32>
    %45 = vector.broadcast %44 : vector<1x1x1xf32> to vector<1x1x3xf32>
    %46 = vector.shape_cast %38 : vector<1x1x1xf32> to vector<1x1x1xf32>
    %47 = vector.broadcast %46 : vector<1x1x1xf32> to vector<1x1x3xf32>
    %48 = arith.select %43, %45, %47 : vector<1x1x3xi1>, vector<1x1x3xf32>
    %49 = vector.shape_cast %30 : vector<1x1x1xf32> to vector<1x1x1xf32>
    %50 = vector.broadcast %49 : vector<1x1x1xf32> to vector<1x1x3xf32>
    %51 = arith.select %41, %50, %48 : vector<1x1x3xi1>, vector<1x1x3xf32>
    %c0_22 = arith.constant 0 : index
    %c0_23 = arith.constant 0 : index
    %c0_24 = arith.constant 0 : index
    %52 = vector.load %arg5[%c0_22, %c0_23, %c0_24] : memref<1x1x3xf32, #tpu.memory_space<vmem>>, vector<1x1x3xf32>
    tpu.vector_store %arg5[%c0_22, %c0_23, %c0_24], %51 {strides = array<i32>} : memref<1x1x3xf32, #tpu.memory_space<vmem>>, vector<1x1x3xf32>,
    return
  }
  func.func @transform_0(%arg0: i32) -> (i32, i32, i32) {
    %c0_i32 = arith.constant 0 : i32
    %c0_i32_0 = arith.constant 0 : i32
    %c0_i32_1 = arith.constant 0 : i32
    return %arg0, %c0_i32, %c0_i32_0 : i32, i32, i32
  }
  func.func @transform_1(%arg0: i32) -> (i32, i32, i32) {
    %c0_i32 = arith.constant 0 : i32
    %c0_i32_0 = arith.constant 0 : i32
    %c0_i32_1 = arith.constant 0 : i32
    return %arg0, %c0_i32, %c0_i32_0 : i32, i32, i32
  }
  func.func @transform_2(%arg0: i32) -> (i32, i32, i32) {
    %c0_i32 = arith.constant 0 : i32
    %c0_i32_0 = arith.constant 0 : i32
    %c0_i32_1 = arith.constant 0 : i32
    return %arg0, %c0_i32, %c0_i32_0 : i32, i32, i32
  }
  func.func @transform_3(%arg0: i32) -> (i32, i32, i32) {
    %c0_i32 = arith.constant 0 : i32
    %c0_i32_0 = arith.constant 0 : i32
    %c0_i32_1 = arith.constant 0 : i32
    return %arg0, %c0_i32, %c0_i32_0 : i32, i32, i32
  }
  func.func @transform_4(%arg0: i32) -> (i32, i32, i32) {
    %c0_i32 = arith.constant 0 : i32
    %c0_i32_0 = arith.constant 0 : i32
    %c0_i32_1 = arith.constant 0 : i32
    return %arg0, %c0_i32, %c0_i32_0 : i32, i32, i32
  }
}

</mosaic_0001>

<bundles_post_ra>
// kernel: tpu_custom_call.1
= control target key start
LH: loop header
LB: loop body
LE: loop exit
PB: predicated region body
PF: predicated region fallthrough
CT: control target
= control target key end

     0   :  { %9 = vsyncpa [#allocation3], 0  ;;  %s691_s0 = inlined_call_operand.vmem [shape: s32[2,1,8], index: 0, kind: input, shape index: {}]   ;;  %s692_s1 = inlined_call_operand.vmem [shape: bf16[2,1,8], index: 1, kind: input, shape index: {}]   ;;  %s693_s2 = inlined_call_operand.vmem [shape: bf16[2,16,8], index: 2, kind: input, shape index: {}]   ;;  %s694_s3 = inlined_call_operand.vmem [shape: bf16[2,16,8], index: 3, kind: input, shape index: {}]   ;;  %s695_s4 = inlined_call_operand.hbm [shape: f32[2,1,3], index: 4, kind: output, shape index: {}]  }
   0x1   :  { %11 = vsyncpa [#allocation3 + $0x1], 0  ;;  %s569_s15 = smov 0   ;;  %s571_s16 = smov 0  }
   0x2   :  { %s573_s17 = smov 0   ;;  %s575_s18 = smov 0  }
   0x3 LB: > { %s590_s19 = sadd.s32 4294967295, %s541_s18   ;;  %s415_s20 = sadd.s32 4294967294, %s541_s18   ;;  %s541_s18 = sphi %s575_s18, %s701_s18   ;;  %s537_s17 = sphi %s573_s17, %s700_s17   ;;  %s533_s16 = sphi %s571_s16, %s699_s16   ;;  %s529_s15 = sphi %s569_s15, %s698_s15  }
   0x4   : > { %s594_s21 = sadd.s32 1, %s541_s18   ;;  %s128_s22 = sadd.s32 1, %s537_s17 }
   0x5   : > { %s125_s23 = ssub.s32 %s541_s18, %s594_s21  ;;  %p138_p0 = scmp.ne.s32.totalorder %s537_s17, %s533_s16 }
   0x6   : > { %p126_p1 = scmp.eq.s32.totalorder %s125_s23, 0  ;;  %p139_p2 = scmp.eq.s32.totalorder %s590_s19, 1 }
   0x7   : > { %p144_p3 = scmp.ne.s32.totalorder %s533_s16, %s529_s15  ;;  %p145_p4 = scmp.eq.s32.totalorder %s415_s20, 1 }
   0x8   : > { %s605_s24 = scalar_select %p126_p1, %s537_s17, %s128_s22  }
   0x9   : > { %p607_p5 = por %p139_p2, %p138_p0  ;;  %p611_p6 = por %p145_p4, %p144_p3 }
   0xa   : > { %p418_p7 = scmp.ge.s32.totalorder %s541_s18, 1  ;;  %p191_p8 = scmp.lt.s32.totalorder %s541_s18, 3 }
   0xc   : > { %p192_p9 = pnand %p418_p7, %p191_p8 }
   0xd   : > { %p227_p10 = scmp.lt.s32.totalorder (!%p192_p9), %s590_s19, 1  ;;  %v272_v0 = vlaneseq (!%p192_p9)  ;;  %vm262_vm0 = vcmask (!%p192_p9), 64512   ;;  %vm304_vm4 = vcmask (!%p192_p9), 57344   ;;  %s225_s20 = sand.u32 (!%p192_p9), 1, %s533_s16   ;;  %vm315_vm7 = vcmask (!%p192_p9), 16384  }
   0xe   : > { %195 = sbr.rel (%p192_p9) target bundleno = 220 (0xdc), region = 36  ;;  %s423_s22 = sshll.u32 (!%p192_p9), %s590_s19, 4 }
   0xf   : > { %v273_v1 = vshrl.u32 (!%p192_p9), %v272_v0, 7  ;;  %v310_v49 = vand.u32 (!%p192_p9), 127, %v272_v0  ;;  %s226_s23 = scalar_lea.vmem (!%p192_p9), [#allocation2], %s225_s20  ;;  %s543_s6 = smov (!%p192_p9), [#allocation2]  }
  0x10   : > { %s483_s7 = sshll.u32 (!%p192_p9), %s543_s6, 4  ;;  %s484_s7 = int_to_ptr.vmem [resolvable:$false] %s483_s7 }
  0x11   : > { %v274_v2 = vadd.s32 (!%p192_p9), 8, %v273_v1  ;;  %v277_v3 = vsub.s32 (!%p192_p9), 0, %v273_v1  ;;  %vm312_vm5 = vcmp.eq.s32.totalorder (!%p192_p9), %v310_v49, 1  ;;  %vm311_vm6 = vcmp.eq.s32.totalorder (!%p192_p9), %v310_v49, 0 }
  0x15   : > { %s619_s27 = scalar_select %p227_p10, %s590_s19, 1 }
  0x16   : > { %s318_s19 = scalar_lea.sflag [#allocation3], %s225_s20 }
  0x17   : > { %s229_s30 = scalar_lea.vmem %s691_s0, %s619_s27  ;;  %s426_s5 = sshll.u32 %s619_s27, 3 }
  0x18   : > { %s237_s8 = scalar_lea.vmem %s693_s2, %s426_s5  ;;  %s242_s11 = scalar_lea.vmem %s694_s3, %s426_s5  ;;  %v243_v4 = vld [vmem:[%s229_s30] sm:$0x1] }
  0x19   : > { %v429_v5 = vld [vmem:[%s237_s8] sm:$0xff]   ;;  %v278_v6 = vrot.slane %v243_v4, %v277_v3  ;;  %s232_s14 = scalar_lea.vmem %s692_s1, %s619_s27  ;;  %vm293_vm3 = vcmp.lt.s32.totalorder %v243_v4, 15  ;;  %s330_s27 = sshll.u32 %s226_s23, 4  ;;  %s651_s27 = int_to_ptr.vmem [resolvable:$true] %s330_s27 }
  0x1a   : > { %v433_v7 = vld [vmem:[%s242_s11] sm:$0xff]   ;;  %v430_v8 = vunpack.c.l.bf16 %v429_v5  ;;  %v431_v9 = vunpack.c.h.bf16 %v429_v5  ;;  %s649_s30 = scalar_lea.hbm %s695_s4, %s423_s22  ;;  %s479_s5 = scalar_lea.vmem %s651_s27, 16 }
  0x1b   : > { %v434_v10 = vunpack.c.l.bf16 %v433_v7  ;;  %v435_v11 = vunpack.c.h.bf16 %v433_v7  ;;  %vm279_vm1 = vcmp.eq.s32.totalorder %v273_v1, %v278_v6  ;;  %vm280_vm2 = vcmp.eq.s32.totalorder %v274_v2, %v278_v6  ;;  %v244_v21 = vld [vmem:[%s232_s14] sm:$0x1]  ;;  %p480_p11 = scmp.ne.s32.totalorder %s651_s27, %s479_s5  ;;  %s485_s8 = scalar_lea.vmem %s484_s7, 32 }
  0x1c   : > { %v281_v12 = vsel %vm279_vm1, %v430_v8, 0.0  ;;  %v282_v13 = vsel %vm280_vm2, %v431_v9, 0.0  ;;  %v245_v23 = vunpack.c.l.bf16 %v244_v21  ;;  %p486_p0 = scmp.lt.s32.totalorder %s651_s27, %s484_s7  ;;  %p487_p1 = scmp.lt.s32.totalorder %s485_s8, %s479_s5 }
  0x1d   : > { %v254_v14 = vmul.f32 1.442695, %v434_v10  ;;  %v256_v15 = vmul.f32 1.442695, %v435_v11  ;;  %v283_v16 = vsel %vm262_vm0, %v281_v12, 0.0  ;;  %v284_v17 = vsel %vm262_vm0, %v282_v13, 0.0  ;;  %p481_p12 = pnand %p480_p11, %p607_p5 }
  0x1e   : > { %v285_v18 = vadd.f32 %v284_v17, %v283_v16  ;;  %v258_v24 = vsub.f32 %v434_v10, %v430_v8  ;;  %v259_v26 = vsub.f32 %v435_v11, %v431_v9  ;;  %v294_v30 = vsub.f32 0.0, %v245_v23  ;;  %p488_p2 = por %p487_p1, %p486_p0 }
  0x1f   : > { %475 = vpow2.f32 %v254_v14  ;;  %p482_p13 = pneg %p481_p12 }
  0x20   : > { %477 = vpow2.f32 %v256_v15  ;;  %v286_v19 = vrot.slane %v285_v18, 4  ;;  %v295_v37 = vsel %vm293_vm3, %v294_v30, 0.0 }
  0x21   : > { %v305_v41 = vsel %vm304_vm4, %v295_v37, 0.0  ;;  %p489_p3 = pnand %p488_p2, %p482_p13 }
  0x22   : > { %v287_v20 = vadd.f32 %v286_v19, %v285_v18 }
  0x24   : > { %v288_v22 = vrot.slane %v287_v20, 2 }
  0x26   : > { %v289_v25 = vadd.f32 %v288_v22, %v287_v20 }
  0x28   : > { %v290_v28 = vrot.slane %v289_v25, 1 }
  0x29   : > { %v476_v27 = vpop.eup %475 }
  0x2a   : > { %v478_v29 = vpop.eup %477  ;;  %v260_v31 = vmul.f32 %v476_v27, %v258_v24  ;;  %v291_v32 = vadd.f32 %v290_v28, %v289_v25 }
  0x2b   : > { %v261_v33 = vmul.f32 %v478_v29, %v259_v26 }
  0x2c   : > { %v263_v34 = vsel %vm262_vm0, %v260_v31, 0.0  ;;  %v292_v35 = vsub.f32 0.0, %v291_v32 }
  0x2d   : > { %v264_v36 = vsel %vm262_vm0, %v261_v33, 0.0 }
  0x2e   : > { %v265_v38 = vadd.f32 %v264_v36, %v263_v34  ;;  %v300_v39 = vsel %vm262_vm0, %v292_v35, 0.0 }
  0x2f   : > { %301 = vadd.xlane.f32.xlu0 %v300_v39 }
  0x30   : > { %v266_v40 = vrot.slane %v265_v38, 4 }
  0x32   : > { %v267_v42 = vadd.f32 %v266_v40, %v265_v38 }
  0x33   : > { %306 = vadd.xlane.f32.xlu0 %v305_v41 }
  0x34   : > { %v268_v43 = vrot.slane %v267_v42, 2 }
  0x36   : > { %v269_v44 = vadd.f32 %v268_v43, %v267_v42 }
  0x38   : > { %v270_v45 = vrot.slane %v269_v44, 1 }
  0x3a   : > { %v271_v46 = vadd.f32 %v270_v45, %v269_v44 }
  0x3c   : > { %v296_v47 = vsel %vm262_vm0, %v271_v46, 0.0 }
  0x3d   : > { %297 = vadd.xlane.f32.xlu1 %v296_v47 }
  0xbc   : > { %v302_v48 = vpop.xlane.xlu0 %301 }
  0xbd   : > { %v303_v51 = vmul.f32 0.125, %v302_v48 }
  0xc0   : > { %v307_v50 = vpop.xlane.xlu0 %306 }
  0xc1   : > { %v308_v52 = vmul.f32 0.125, %v307_v50 }
  0xc3   : > { %v313_v55 = vsel %vm312_vm5, %v303_v51, %v308_v52 }
  0xca   : > { %v298_v53 = vpop.xlane.xlu1 %297 }
  0xcb   : > { %v299_v54 = vmul.f32 0.125, %v298_v53 }
  0xcd   : > { %v314_v56 = vsel %vm311_vm6, %v299_v54, %v313_v55 }
  0xce   : > { %316 = vst.msk [vmem:[%s226_s23] sm:$0x1] %vm315_vm7, %v314_v56 }
  0xcf   : > { %492 = shalt.err (!%p489_p3)
}
  0xd0   : > { %s493_s9 = scalar_lea.hbm %s649_s30, 16  ;;  %s497_s12 = scalar_lea.hbm %s695_s4, 32 }
  0xd1   : > { %p494_p4 = scmp.ne.s32.totalorder %s649_s30, %s493_s9  ;;  %p498_p9 = scmp.lt.u32.totalorder %s649_s30, %s695_s4 }
  0xd2   : > { %p499_p10 = scmp.lt.u32.totalorder %s497_s12, %s493_s9  ;;  %p501_p12 = scmp.lt.u32.totalorder %s493_s9, %s649_s30 }
  0xd3   : > { %p495_p7 = pnand %p494_p4, %p607_p5 }
  0xd4   : > { %p500_p11 = por %p499_p10, %p498_p9 }
  0xd5   : > { %p496_p8 = pneg %p495_p7 }
  0xd6   : > { %p502_p13 = por %p501_p12, %p500_p11 }
  0xd8   : > { %p503_p0 = pnand %p502_p13, %p496_p8 }
  0xda   : > { %506 = shalt.err (!%p503_p0)
}
  0xdb   : > { %436 = dma.vmem_to_hbm [thread:$0]  (%p607_p5), %s651_s27, 16, %s649_s30, %s318_s19  }
  0xdc PF: > { %p442_p1 = scmp.ge.s32.totalorder %s541_s18, 2  ;;  %s342_s20 = sand.u32 1, %s529_s15  }
  0xdd   : > { %s343_s22 = scalar_lea.sflag [#allocation3], %s342_s20 }
  0xde   : > { %p439_p2 = pnand %p442_p1, %p611_p6 }
  0xe0   : > { %524 = dma.done.wait (!%p439_p2), %s343_s22, 16  }
  0xe1   : > { %526 = vsyncadd (!%p439_p2), %s343_s22, 4294967280  ;;  %p14_p3 = scmp.ge.s32.totalorder %s594_s21, 4   ;;  %s698_s15 = smov %s533_s16 }
  0xe2   : > { %s699_s16 = smov %s537_s17  ;;  %s700_s17 = smov %s605_s24 }
  0xe3   : > { %s701_s18 = smov %s594_s21  ;;  %16 = sbr.rel (!%p14_p3) target bundleno = 3 (0x3), region = 80 }
  0xea   :  { %347 = vsyncpa [#allocation3], 1 }
  0xeb   :  { %349 = vsyncpa [#allocation3 + $0x1], 1 }

</bundles_post_ra>
